<compile_context>
chip_gen: v7x
topology: tpu7x:2x2x1
jax: 0.10.0
libtpu: 0.0.40
codegen_flags: <defaults>
</compile_context>

<pallas_src>
import functools

import jax
import jax.numpy as jnp
from jax.experimental import pallas as pl
from jax.experimental.pallas import tpu as pltpu


def _mean_kernel(x_ref, o_ref, *, inv_s):
    # x_ref / o_ref: (TB, TC, S_pad).  Padded lanes (if any) are zero, so the
    # sum over S_pad equals the sum over S; inv_s is 1/S of the ORIGINAL S.
    pooled = jnp.sum(x_ref[...], axis=-1, keepdims=True,
                     dtype=jnp.float32) * inv_s
    o_ref[...] = jnp.broadcast_to(pooled.astype(o_ref.dtype), o_ref.shape)


def _masked_mean_kernel(x_ref, m_ref, o_ref):
    # x_ref / o_ref: (TB, TC, S_pad), m_ref: (TB, 1, S_pad) in its original
    # dtype (cast in-kernel -- the VPU has plenty of slack here).  Lane-padded
    # entries of both x and mask are zero, so num/den are unchanged.
    x = x_ref[...]
    m = m_ref[...]
    # NOTE: for bf16 x with a FRACTIONAL (non-0/1) mask, the product below is
    # done in bf16 before the f32 accumulation (slightly lower precision than
    # an all-f32 reference).  Exact for 0/1 masks; kept to avoid materializing
    # a full f32 copy of the tile.
    num = jnp.sum(x * m.astype(x.dtype), axis=-1, keepdims=True,
                  dtype=jnp.float32)                              # (TB, TC, 1)
    den = jnp.sum(m.astype(jnp.float32), axis=-1, keepdims=True)  # (TB, 1, 1)
    # EUP reciprocal (free slot); one Newton step on the tiny (TB,1,1) array
    # restores full f32 accuracy at negligible VALU cost.
    inv = pl.reciprocal(den, approx=True)
    inv = inv * (2.0 - den * inv)
    pooled = num * inv                                            # (TB, TC, 1)
    # NOTE: matches the PyTorch reference -- an all-zero mask row gives
    # inf/nan.  Boundary blocks (N % TB != 0 or C % TC != 0) may also see
    # zero/garbage mask rows and produce inf/nan that the masked writeback
    # then discards; this is harmless -- do NOT "fix" it with a clamp in the
    # hot path.
    o_ref[...] = jnp.broadcast_to(pooled.astype(o_ref.dtype), o_ref.shape)


def _device_budgets():
    """(tile_target_bytes, vmem_limit_bytes) derived from the TPU generation."""
    vmem = None
    try:
        info = pltpu.get_tpu_info()
        vmem = getattr(info, "vmem_capacity_bytes", None)
    except Exception:
        vmem = None
    if vmem is None:
        # Unknown generation: conservative middle ground.
        return 4 * 1024 * 1024, 32 * 1024 * 1024
    if vmem >= 100 * 1024 * 1024:
        # v5e / v6e: 128 MiB physical VMEM -> big blocks, raise scoped limit
        # (v5e's scoped default is only 16 MiB, so the override matters there).
        return 8 * 1024 * 1024, 64 * 1024 * 1024
    # v7x: 64 MiB VMEM per TC -> cap budget so in+out double-buffering fits.
    return 3 * 1024 * 1024, 48 * 1024 * 1024


def _choose_tiles(N, C, S, itemsize, target_bytes,
                  min_split_bytes=2 * 1024 * 1024):
    """Pick (TB, TC) so one (TB, TC, S) input block is ~target_bytes.

    The whole S (reduction) axis stays inside one block.  TC is a multiple of
    the dtype's sublane packing factor (8 for f32, 16 for bf16, 32 for int8)
    or == C; TB groups several batch elements when C*S is small so per-grid-
    step overhead is amortized over MiB-scale DMAs.  If the whole problem
    collapses into a single block but is bigger than ~2 MiB, it is split into
    >=2 grid steps so the two v7x TensorCores both get work (on single-TC
    chips the extra step costs ~0.35us, noise for MiB-scale blocks).
    """
    packing = max(8, 32 // max(int(itemsize), 1))   # f32->8, bf16->16, int8->32
    row_bytes = max(S * itemsize, 1)
    cs_bytes = C * row_bytes
    if cs_bytes <= target_bytes:
        tb = int(min(N, max(1, target_bytes // cs_bytes)))
        tc = C
    else:
        tb = 1
        tc = int(target_bytes // row_bytes)
        if tc >= C or C <= packing:
            tc = C
        else:
            tc = max(packing, (tc // packing) * packing)

    # Force >=2 grid steps for "big enough" problems that would otherwise be a
    # single block (v7x megacore sharding via ("parallel", "parallel")).
    total_bytes = N * C * row_bytes
    if (pl.cdiv(N, tb) * pl.cdiv(C, tc) == 1) and total_bytes > min_split_bytes:
        if N >= 2:
            tb = pl.cdiv(N, 2)
        elif C > packing:
            tc = max(packing, (pl.cdiv(C, 2) // packing) * packing)
    return int(tb), int(tc)


def mean_pool(x, mask=None, n_dim=2, *, tile_target_bytes=None,
              donate_x=False):
    """Pallas implementation of Mean.forward.

    x    : (N, C, L) if n_dim == 1, (N, C, H, W) if n_dim == 2
    mask : optional, (N, L) / (N, 1, L) or (N, H, W) / (N, 1, H, W)
    Returns an array with the same shape/dtype as x.
    donate_x: alias x's (flattened/padded) buffer to the output; only saves
              HBM if the caller actually donates x under jit.
    """
    assert n_dim in (1, 2)
    x_sz = x.shape
    assert len(x_sz) == n_dim + 2
    N, C = x_sz[0], x_sz[1]
    S = 1
    for d in x_sz[2:]:
        S *= d

    tile_target, vmem_limit = _device_budgets()
    if tile_target_bytes is not None:
        tile_target = tile_target_bytes

    # Pad S to a multiple of 128 so every broadcast store is lane-dense.
    pad = (-S) % 128
    S_pad = S + pad

    x_flat = x.reshape(N, C, S)
    if pad:
        x_flat = jnp.pad(x_flat, ((0, 0), (0, 0), (0, pad)))

    tb, tc = _choose_tiles(N, C, S_pad, x.dtype.itemsize, tile_target)
    # Grid order: (batch, channel) -- channel MUST stay the last (fastest)
    # axis so the per-batch mask block is reused across consecutive c steps.
    grid = (pl.cdiv(N, tb), pl.cdiv(C, tc))

    x_spec = pl.BlockSpec((tb, tc, S_pad), lambda b, c: (b, c, 0))
    out_spec = pl.BlockSpec((tb, tc, S_pad), lambda b, c: (b, c, 0))
    out_shape = jax.ShapeDtypeStruct((N, C, S_pad), x.dtype)
    cparams = pltpu.CompilerParams(
        dimension_semantics=("parallel", "parallel"),
        vmem_limit_bytes=vmem_limit,
    )
    io_aliases = {0: 0} if donate_x else {}

    if mask is None:
        kernel = functools.partial(_mean_kernel, inv_s=1.0 / S)
        out_flat = pl.pallas_call(
            kernel,
            out_shape=out_shape,
            grid=grid,
            in_specs=[x_spec],
            out_specs=out_spec,
            compiler_params=cparams,
            input_output_aliases=io_aliases,
        )(x_flat)
    else:
        # Keep the mask in its original dtype (no wrapper-side f32 round trip
        # through HBM); widen booleans to x.dtype so the kernel sees a plain
        # numeric mask.  Padded lanes are zero -> num/den unchanged.
        m_flat = mask.reshape(N, 1, S)
        if pad:
            m_flat = jnp.pad(m_flat, ((0, 0), (0, 0), (0, pad)))
        if m_flat.dtype == jnp.bool_:
            m_flat = m_flat.astype(x.dtype)
        m_spec = pl.BlockSpec((tb, 1, S_pad), lambda b, c: (b, 0, 0))
        out_flat = pl.pallas_call(
            _masked_mean_kernel,
            out_shape=out_shape,
            grid=grid,
            in_specs=[x_spec, m_spec],
            out_specs=out_spec,
            compiler_params=cparams,
            input_output_aliases=io_aliases,
        )(x_flat, m_flat)

    if pad:
        out_flat = out_flat[:, :, :S]
    return out_flat.reshape(x_sz)


def _ref_mean_pool(x, mask=None, n_dim=2):
    dims = (2,) if n_dim == 1 else (2, 3)
    xf = x.astype(jnp.float32)
    if mask is None:
        pooled = jnp.mean(xf, axis=dims, keepdims=True)
    else:
        m = mask.reshape(x.shape[0], 1, *x.shape[2:]).astype(jnp.float32)
        pooled = (jnp.sum(xf * m, axis=dims, keepdims=True)
                  / jnp.sum(m, axis=dims, keepdims=True))
    return jnp.broadcast_to(pooled, x.shape).astype(x.dtype)


if __name__ == "__main__":
    key = jax.random.PRNGKey(0)
    k1, k2, k3, k4 = jax.random.split(key, 4)

    def check(out, ref, atol=1e-5, rtol=1e-5):
        assert out.shape == ref.shape and out.dtype == ref.dtype
        assert jnp.allclose(out.astype(jnp.float32), ref.astype(jnp.float32),
                            atol=atol, rtol=rtol)

    # ---- n_dim = 2, small NCHW, unmasked & masked (S = 256, lane-dense) ----
    N, C, H, W = 2, 4, 16, 16
    x = jax.random.normal(k1, (N, C, H, W), dtype=jnp.float32)
    mask = (jax.random.uniform(k2, (N, H, W)) > 0.3).astype(jnp.float32)
    check(jax.block_until_ready(mean_pool(x, None, n_dim=2)),
          _ref_mean_pool(x, None, n_dim=2))
    check(jax.block_until_ready(mean_pool(x, mask, n_dim=2)),
          _ref_mean_pool(x, mask, n_dim=2))

    # ---- n_dim = 1, (N, C, L) with L NOT a multiple of 128 (wrapper pads) ----
    L = 50
    x1 = jax.random.normal(k3, (N, C, L), dtype=jnp.float32)
    mask1 = jax.random.uniform(k2, (N, L)) > 0.5          # boolean mask
    check(jax.block_until_ready(mean_pool(x1, None, n_dim=1)),
          _ref_mean_pool(x1, None, n_dim=1))
    check(jax.block_until_ready(mean_pool(x1, mask1, n_dim=1)),
          _ref_mean_pool(x1, mask1, n_dim=1))

    # ---- n_dim = 2 with H*W not a multiple of 128 (S = 120 -> padded to 128) ----
    xp = jax.random.normal(k4, (2, 4, 10, 12), dtype=jnp.float32)
    maskp = (jax.random.uniform(k1, (2, 10, 12)) > 0.4).astype(jnp.float32)
    check(jax.block_until_ready(mean_pool(xp, None, n_dim=2)),
          _ref_mean_pool(xp, None, n_dim=2))
    check(jax.block_until_ready(mean_pool(xp, maskp, n_dim=2)),
          _ref_mean_pool(xp, maskp, n_dim=2))

    # ---- forced multi-step grids: C-tiling and batch-tiling ----
    x2 = jax.random.normal(k4, (3, 32, 8, 16), dtype=jnp.float32)
    mask2 = (jax.random.uniform(k2, (3, 8, 16)) > 0.4).astype(jnp.float32)
    check(jax.block_until_ready(
        mean_pool(x2, None, n_dim=2, tile_target_bytes=8 * 1024)),
        _ref_mean_pool(x2, None, n_dim=2))
    check(jax.block_until_ready(
        mean_pool(x2, mask2, n_dim=2, tile_target_bytes=8 * 1024)),
        _ref_mean_pool(x2, mask2, n_dim=2))

    x3 = jax.random.normal(k1, (4, 4, 16, 16), dtype=jnp.float32)
    mask3 = (jax.random.uniform(k3, (4, 16, 16)) > 0.5).astype(jnp.float32)
    check(jax.block_until_ready(
        mean_pool(x3, mask3, n_dim=2, tile_target_bytes=8 * 1024)),
        _ref_mean_pool(x3, mask3, n_dim=2))

    # ---- bf16 input: dtype-aware TC packing; reduce in f32, cast pooled only ----
    xb = x.astype(jnp.bfloat16)
    check(jax.block_until_ready(mean_pool(xb, None, n_dim=2)),
          _ref_mean_pool(xb, None, n_dim=2), atol=2e-2, rtol=2e-2)
    check(jax.block_until_ready(mean_pool(xb, mask, n_dim=2)),
          _ref_mean_pool(xb, mask, n_dim=2), atol=2e-2, rtol=2e-2)

    print("KERNEL_OK")
</pallas_src>

<mosaic_0001>
module attributes {stable_mosaic.version = 11 : i64} {
  func.func @_mean_kernel(%arg0: i32, %arg1: i32, %arg2: memref<2x4x256xf32, #tpu.memory_space<vmem>>, %arg3: memref<2x4x256xf32, #tpu.memory_space<vmem>>) attributes {dimension_semantics = [#tpu.dimension_semantics<parallel>, #tpu.dimension_semantics<parallel>], iteration_bounds = array<i64: 1, 1>, scalar_prefetch = 0 : i64, scratch_operands = 0 : i64, tpu.core_type = #tpu.core_type<tc>, window_params = [{transform_indices = @transform_0, window_bounds = array<i64: 2, 4, 256>}, {transform_indices = @transform_1, window_bounds = array<i64: 2, 4, 256>}]} {
    %c0 = arith.constant 0 : index
    %c0_0 = arith.constant 0 : index
    %c0_1 = arith.constant 0 : index
    %0 = vector.load %arg2[%c0, %c0_0, %c0_1] : memref<2x4x256xf32, #tpu.memory_space<vmem>>, vector<2x4x256xf32>
    %cst = arith.constant dense<0.000000e+00> : vector<2x4xf32>
    %1 = vector.multi_reduction <add>, %0, %cst [2] : vector<2x4x256xf32> to vector<2x4xf32>
    %2 = vector.shape_cast %1 : vector<2x4xf32> to vector<2x4x1xf32>
    %cst_2 = arith.constant 3.906250e-03 : f32
    %3 = vector.broadcast %cst_2 : f32 to vector<2x4x1xf32>
    %4 = arith.mulf %2, %3 : vector<2x4x1xf32>
    %5 = vector.shape_cast %4 : vector<2x4x1xf32> to vector<2x4x1xf32>
    %6 = vector.broadcast %5 : vector<2x4x1xf32> to vector<2x4x256xf32>
    %c0_3 = arith.constant 0 : index
    %c0_4 = arith.constant 0 : index
    %c0_5 = arith.constant 0 : index
    %7 = vector.load %arg3[%c0_3, %c0_4, %c0_5] : memref<2x4x256xf32, #tpu.memory_space<vmem>>, vector<2x4x256xf32>
    tpu.vector_store %arg3[%c0_3, %c0_4, %c0_5], %6 {strides = array<i32>} : memref<2x4x256xf32, #tpu.memory_space<vmem>>, vector<2x4x256xf32>,
    return
  }
  func.func @transform_0(%arg0: i32, %arg1: i32) -> (i32, i32, i32) {
    %c0_i32 = arith.constant 0 : i32
    %c0_i32_0 = arith.constant 0 : i32
    return %arg0, %arg1, %c0_i32 : i32, i32, i32
  }
  func.func @transform_1(%arg0: i32, %arg1: i32) -> (i32, i32, i32) {
    %c0_i32 = arith.constant 0 : i32
    %c0_i32_0 = arith.constant 0 : i32
    return %arg0, %arg1, %c0_i32 : i32, i32, i32
  }
}

</mosaic_0001>

<bundles_post_ra>
// kernel: tpu_custom_call.1
= control target key start
LH: loop header
LB: loop body
LE: loop exit
PB: predicated region body
PF: predicated region fallthrough
CT: control target
= control target key end

     0   :  { %6 = vsyncpa [#allocation3], 0  ;;  %s181_s0 = inlined_call_operand.hbm [shape: f32[2,4,256], index: 0, kind: input, shape index: {}]   ;;  %s182_s1 = inlined_call_operand.hbm [shape: f32[2,4,256], index: 1, kind: output, shape index: {}]  }
   0x1   :  { %7 = vsyncpa [#allocation4], 0  ;;  %s136_s6 = smov [#allocation2]   ;;  %s88_s10 = scalar_lea.hbm %s181_s0, 256 }
   0x2   :  { %s13_s7 = sshll.u32 %s136_s6, 4  ;;  %p89_p0 = scmp.ne.s32.totalorder %s181_s0, %s88_s10  ;;  %s14_s7 = int_to_ptr.vmem [resolvable:$true] %s13_s7 }
   0x3   :  { %p92_p1 = scmp.lt.u32.totalorder %s88_s10, %s181_s0 }
   0x5   :  { %p94_p2 = pnand %p92_p1, %p89_p0 }
   0x7   :  { %97 = shalt.err (!%p94_p2)
}
   0x8   :  { %s98_s15 = scalar_lea.vmem %s14_s7, 256  ;;  %p103_p4 = scmp.lt.s32.totalorder %s14_s7, %s14_s7 }
   0x9   :  { %p99_p3 = scmp.ne.s32.totalorder %s14_s7, %s98_s15  ;;  %p104_p5 = scmp.lt.s32.totalorder %s98_s15, %s98_s15 }
   0xb   :  { %p105_p6 = por %p104_p5, %p103_p4 }
   0xd   :  { %p106_p7 = pnand %p105_p6, %p99_p3 }
   0xf   :  { %109 = shalt.err (!%p106_p7)
}
  0x10   :  { %s137_s16 = smov 128   ;;  %s138_s17 = smov 8  }
  0x11   :  { %19 = dma.hbm_to_vmem [thread:$0]  %s181_s0, 256, %s14_s7, [#allocation3], %s137_s16, %s137_s16, %s138_s17  }
  0x12   :  { %132 = dma.done.wait [#allocation3], 256  }
  0x13   :  { %133 = vsyncadd [#allocation3], 4294967040  ;;  %vm31_vm0 = vcmask 1043456   ;;  %v23_v0 = vld [vmem:[#allocation2] sm:$0xff]  ;;  %v24_v1 = vld [vmem:[#allocation2 + $0x8] sm:$0xff]  ;;  %v49_v12 = vlaneseq  ;;  %s140_s0 = smov [#allocation5]  }
  0x14   :  { %v27_v2 = vcombine.high %v23_v0, %v23_v0  ;;  %v32_v3 = vsel %vm31_vm0, %v23_v0, 0.0  ;;  %v28_v4 = vcombine.high %v24_v1, %v24_v1  ;;  %v37_v6 = vsel %vm31_vm0, %v24_v1, 0.0  ;;  %s69_s20 = sshll.u32 %s140_s0, 4  ;;  %s70_s20 = int_to_ptr.vmem [resolvable:$true] %s69_s20 }
  0x15   :  { %v139_v10 = vmov 839922192   ;;  %v50_v14 = vshrl.u32 %v49_v12, 7  ;;  %s110_s21 = scalar_lea.vmem %s70_s20, 256  ;;  %p115_p9 = scmp.lt.s32.totalorder %s70_s20, %s70_s20 }
  0x16   :  { %v33_v5 = vsel %vm31_vm0, %v27_v2, 0.0  ;;  %v38_v7 = vsel %vm31_vm0, %v28_v4, 0.0  ;;  %v47_v11 = vunpack.c.l.s4 %v139_v10  ;;  %p111_p8 = scmp.ne.s32.totalorder %s70_s20, %s110_s21  ;;  %p116_p10 = scmp.lt.s32.totalorder %s110_s21, %s110_s21 }
  0x17   :  { %v34_v8 = vadd.f32 %v33_v5, %v32_v3  ;;  %v39_v9 = vadd.f32 %v38_v7, %v37_v6 }
  0x18   :  { %v48_v13 = vunpack.c.0.s8 %v47_v11  ;;  %p117_p11 = por %p116_p10, %p115_p9 }
  0x19   :  { %35 = vadd.xlane.f32.xlu0 %v34_v8 }
  0x1a   :  { %v51_v15 = vsub.s32 %v48_v13, %v50_v14  ;;  %p118_p12 = pnand %p117_p11, %p111_p8 }
  0x1d   :  { %40 = vadd.xlane.f32.xlu0 %v39_v9 }
  0xa6   :  { %v36_v16 = vpop.xlane.xlu0 %35 }
  0xa7   :  { %v42_v17 = vmul.f32 0.00390625, %v36_v16 }
  0xa9   :  { %v52_v18 = vrot.slane %v42_v17, %v51_v15 }
  0xaa   :  { %v41_v19 = vpop.xlane.xlu0 %40 }
  0xab   :  { %62 = vst [vmem:[#allocation5] sm:$0xff] %v52_v18  ;;  %v43_v20 = vmul.f32 0.00390625, %v41_v19 }
  0xad   :  { %v59_v21 = vrot.slane %v43_v20, %v51_v15 }
  0xaf   :  { %63 = vst [vmem:[#allocation5 + $0x8] sm:$0xff] %v59_v21 }
  0xb0   :  { %121 = shalt.err (!%p118_p12)
}
  0xb1   :  { %s122_s24 = scalar_lea.hbm %s182_s1, 256 }
  0xb2   :  { %p123_p13 = scmp.ne.s32.totalorder %s182_s1, %s122_s24  ;;  %p126_p0 = scmp.lt.u32.totalorder %s122_s24, %s182_s1 }
  0xb4   :  { %p128_p1 = pnand %p126_p0, %p123_p13 }
  0xb6   :  { %131 = shalt.err (!%p128_p1)
}
  0xb7   :  { %75 = dma.vmem_to_hbm [thread:$0]  %s70_s20, 256, %s182_s1, [#allocation4], %s137_s16, %s137_s16, %s138_s17  }
  0xb8   :  { %134 = dma.done.wait [#allocation4], 256  }
  0xb9   :  { %135 = vsyncadd [#allocation4], 4294967040 }
  0xba   :  { %79 = vsyncpa [#allocation3], 1 }
  0xbb   :  { %80 = vsyncpa [#allocation4], 1 }

</bundles_post_ra>
